<compile_context>
chip_gen: v6e
topology: v6e:2x2x1
jax: 0.10.0
libtpu: 0.0.40
codegen_flags: <defaults>
</compile_context>

<pallas_src>
import functools
import math

import numpy as np

import jax
import jax.numpy as jnp
from jax import lax
from jax.experimental import pallas as pl
from jax.experimental.pallas import tpu as pltpu

_COSINE_EPS = 1e-8   # torch.nn.CosineSimilarity default eps


def _ntxent_kernel(zn_ref, zt_ref, out_ref, *, row_tile, half_pad, half_valid,
                   inv_temperature, diag_correction):
    TQ = row_tile
    n_pad_total = 2 * half_pad
    inv_t = jnp.float32(inv_temperature)

    row_start = pl.multiple_of(pl.program_id(0) * TQ, TQ)

    # Query tile with 1/temperature folded in (tiny (TQ, D) VPU multiply; we
    # deliberately keep this in-kernel rather than pre-scaling the wrapper
    # array, because the partner rows must stay unscaled).
    zq = zn_ref[pl.ds(row_start, TQ), :] * inv_t                       # (TQ, D) f32

    # (TQ, N) cosine-similarity slab on the MXU: (TQ, D) x (D, N).
    sim = lax.dot_general(zq.astype(zt_ref.dtype), zt_ref[...],
                          (((1,), (0,)), ((), ())),
                          preferred_element_type=jnp.float32)          # (TQ, N)

    # Positive logit: row i pairs with row (i + half_pad) mod N.  With
    # TQ | half_pad the partners of this tile form one contiguous slice.
    partner_start = pl.multiple_of((row_start + half_pad) % n_pad_total, TQ)
    zp = zn_ref[pl.ds(partner_start, TQ), :]
    pos = jnp.sum(zq * zp, axis=-1, keepdims=True)                     # (TQ, 1)

    # Closed-form masked log-sum-exp (no iota/compare/select/row-max):
    # unit-norm rows => sim[i,i] == inv_t and sim[i,j] <= inv_t, so inv_t is a
    # valid max; subtract the diagonal term (== 1) and the padded columns'
    # exact contribution (2*pad * exp(-inv_t)).
    s = jnp.sum(jnp.exp(sim - inv_t), axis=-1, keepdims=True)          # (TQ, 1)
    lse = inv_t + jnp.log(jnp.maximum(s - jnp.float32(diag_correction),
                                      jnp.float32(1e-30)))

    # Zero out padded query rows so the wrapper reduction is a plain sum.
    rows = row_start + lax.broadcasted_iota(jnp.int32, (TQ, 1), 0)
    valid = (rows < half_valid) | ((rows >= half_pad) &
                                   (rows < half_pad + half_valid))
    out_ref[...] = jnp.where(valid, lse - pos, jnp.float32(0.0))


def _round_up(x, m):
    return ((x + m - 1) // m) * m


def _plan(batch_size, feat_dim):
    """Generation-aware (row_tile, padded_half_batch, vmem_limit_bytes)."""
    try:
        cap = int(getattr(pltpu.get_tpu_info(), "vmem_capacity_bytes",
                          64 * 1024 * 1024))
    except Exception:
        cap = 64 * 1024 * 1024
    if cap >= 100 * 1024 * 1024:          # v5e / v6e: 128 MiB physical VMEM
        budget = 88 * 1024 * 1024
    else:                                  # v7x: 64 MiB per TensorCore
        budget = 36 * 1024 * 1024

    n_est = 2 * _round_up(batch_size, 8)
    # Live f32 bytes ~= resident inputs (x2 double-buffer headroom) +
    # ~4 live (TQ, N) slab temporaries (post mask-removal).
    avail = budget - 16 * n_est * feat_dim
    cap_rows = max(8, avail // (16 * n_est))

    tq = min(cap_rows, 1024, _round_up(batch_size, 8))
    tq = (tq // 128) * 128 if tq >= 128 else max(8, (tq // 8) * 8)
    # Bound padding waste (< 1/8 of padded rows) by shrinking the tile.
    while tq > 8 and 8 * (_round_up(batch_size, tq) - batch_size) > _round_up(
            batch_size, tq):
        tq = max(8, ((tq // 2) // 8) * 8)
    b_pad = _round_up(batch_size, tq)
    return tq, b_pad, budget


def ntxent_loss(z_i, z_j, temperature, *, matmul_dtype=jnp.float32):
    """NT-Xent loss.  z_i, z_j: (B, D) float.  Returns scalar float32.

    matmul_dtype=jnp.bfloat16 trades ~1e-3 similarity error for ~3x MXU
    throughput; the default float32 keeps parity with the torch reference.
    """
    assert z_i.shape == z_j.shape and z_i.ndim == 2
    B, D = z_i.shape
    N = 2 * B
    inv_t = 1.0 / float(temperature)

    TQ, B_pad, vmem_limit = _plan(B, D)
    N_pad = 2 * B_pad
    pad = B_pad - B

    z_i = z_i.astype(jnp.float32)
    z_j = z_j.astype(jnp.float32)
    if pad:
        z_i = jnp.pad(z_i, ((0, pad), (0, 0)))
        z_j = jnp.pad(z_j, ((0, pad), (0, 0)))
    z = jnp.concatenate([z_i, z_j], axis=0)                   # (N_pad, D)

    # One-time L2 row normalization (hoisted out of the kernel).  Padded rows
    # normalize to exact zero vectors.
    sq = jnp.sum(z * z, axis=-1, keepdims=True)
    zn = z * lax.rsqrt(jnp.maximum(sq, jnp.float32(_COSINE_EPS * _COSINE_EPS)))
    zt = zn.T.astype(matmul_dtype)                            # (D, N_pad) MXU RHS

    kernel = functools.partial(
        _ntxent_kernel, row_tile=TQ, half_pad=B_pad, half_valid=B,
        inv_temperature=inv_t,
        diag_correction=1.0 + 2.0 * pad * math.exp(-inv_t))

    per_row = pl.pallas_call(
        kernel,
        out_shape=jax.ShapeDtypeStruct((N_pad, 1), jnp.float32),
        grid_spec=pltpu.PrefetchScalarGridSpec(
            num_scalar_prefetch=0,
            grid=(N_pad // TQ,),
            in_specs=[
                pl.BlockSpec((N_pad, D), lambda i: (0, 0)),   # zn, VMEM-resident
                pl.BlockSpec((D, N_pad), lambda i: (0, 0)),   # zn^T, VMEM-resident
            ],
            out_specs=pl.BlockSpec((TQ, 1), lambda i: (i, 0)),
        ),
        compiler_params=pltpu.CompilerParams(
            dimension_semantics=("parallel",),
            vmem_limit_bytes=int(vmem_limit)),
    )(zn, zt)

    # Tiny final reduction (padded rows are already zero): CE(sum) / N.
    return jnp.sum(per_row) / jnp.float32(N)


def _reference_ntxent(z_i, z_j, temperature):
    """float64 numpy reference mirroring the PyTorch forward pass exactly."""
    z_i = np.asarray(z_i, dtype=np.float64)
    z_j = np.asarray(z_j, dtype=np.float64)
    B = z_i.shape[0]
    N = 2 * B
    z = np.concatenate([z_i, z_j], axis=0)
    norm = np.linalg.norm(z, axis=-1, keepdims=True)
    sim = (z @ z.T) / np.maximum(norm * norm.T, _COSINE_EPS) / temperature
    sim_i_j = np.diagonal(sim, offset=B)
    sim_j_i = np.diagonal(sim, offset=-B)
    pos = np.concatenate([sim_i_j, sim_j_i]).reshape(N, 1)
    mask = np.ones((N, N), dtype=bool)
    np.fill_diagonal(mask, False)
    for i in range(B):
        mask[i, B + i] = False
        mask[B + i, i] = False
    neg = sim[mask].reshape(N, -1)
    logits = np.concatenate([pos, neg], axis=1)
    m = logits.max(axis=1, keepdims=True)
    lse = (m + np.log(np.exp(logits - m).sum(axis=1, keepdims=True))).ravel()
    return float((lse - logits[:, 0]).sum() / N)   # CE(sum, labels=0) / N


def _check(B, D, temperature, key):
    k1, k2 = jax.random.split(key)
    z_i = jax.random.normal(k1, (B, D), dtype=jnp.float32)
    z_j = jax.random.normal(k2, (B, D), dtype=jnp.float32)
    loss = jax.block_until_ready(ntxent_loss(z_i, z_j, temperature))
    ref = _reference_ntxent(np.asarray(z_i), np.asarray(z_j), temperature)
    # f32 kernel vs f64 reference: ~1e-6 error with exact-f32 MXU passes; the
    # tolerance also covers a bf16-pass default matmul precision while still
    # catching structural bugs (wrong mask / partner / normalization), which
    # shift the loss by O(0.1+).
    assert np.isfinite(float(loss)), float(loss)
    assert abs(float(loss) - ref) <= 1e-2 + 1e-2 * abs(ref), (float(loss), ref)


if __name__ == "__main__":
    key = jax.random.PRNGKey(0)
    k1, k2 = jax.random.split(key)
    _check(8, 32, 0.5, k1)   # aligned batch (no padding)
    _check(6, 32, 0.3, k2)   # unaligned batch -> exercises row/column padding
    print("KERNEL_OK")
</pallas_src>

<mosaic_0001>
module attributes {stable_mosaic.version = 11 : i64} {
  func.func @_ntxent_kernel(%arg0: i32, %arg1: memref<16x32xf32, #tpu.memory_space<vmem>>, %arg2: memref<32x16xf32, #tpu.memory_space<vmem>>, %arg3: memref<8x1xf32, #tpu.memory_space<vmem>>) attributes {dimension_semantics = [#tpu.dimension_semantics<parallel>], iteration_bounds = array<i64: 2>, scalar_prefetch = 0 : i64, scratch_operands = 0 : i64, tpu.core_type = #tpu.core_type<tc>, window_params = [{pipeline_mode = #tpu.pipeline_mode<synchronous>, transform_indices = @transform_0, window_bounds = array<i64: 16, 32>}, {pipeline_mode = #tpu.pipeline_mode<synchronous>, transform_indices = @transform_1, window_bounds = array<i64: 32, 16>}, {transform_indices = @transform_2, window_bounds = array<i64: 8, 1>}]} {
    %c8_i32 = arith.constant 8 : i32
    %0 = arith.muli %arg0, %c8_i32 : i32
    %1 = tpu.assume_multiple %0, 8 : i32
    %2 = arith.index_cast %1 : i32 to index
    %c0 = arith.constant 0 : index
    %3 = vector.load %arg1[%2, %c0] : memref<16x32xf32, #tpu.memory_space<vmem>>, vector<8x32xf32>
    %cst = arith.constant 2.000000e+00 : f32
    %4 = vector.broadcast %cst : f32 to vector<8x32xf32>
    %5 = arith.mulf %3, %4 : vector<8x32xf32>
    %c0_0 = arith.constant 0 : index
    %c0_1 = arith.constant 0 : index
    %6 = vector.load %arg2[%c0_0, %c0_1] : memref<32x16xf32, #tpu.memory_space<vmem>>, vector<32x16xf32>
    %cst_2 = arith.constant dense<0.000000e+00> : vector<8x16xf32>
    %7 = tpu.matmul %5, %6, %cst_2 {dimension_numbers = #tpu.dot_dimension_numbers<[1], [0], [0], [1], [0, 0, 1, 1], [], []>} : vector<8x32xf32>, vector<32x16xf32>, vector<8x16xf32> -> vector<8x16xf32>
    %c8_i32_3 = arith.constant 8 : i32
    %8 = arith.addi %1, %c8_i32_3 : i32
    %c16_i32 = arith.constant 16 : i32
    %c0_i32 = arith.constant 0 : i32
    %9 = arith.cmpi eq, %c16_i32, %c0_i32 : i32
    %c1_i32 = arith.constant 1 : i32
    %10 = arith.select %9, %c1_i32, %c16_i32 : i32
    %11 = arith.remsi %8, %10 : i32
    %c0_i32_4 = arith.constant 0 : i32
    %12 = arith.cmpi ne, %11, %c0_i32_4 : i32
    %c0_i32_5 = arith.constant 0 : i32
    %13 = arith.cmpi slt, %11, %c0_i32_5 : i32
    %c0_i32_6 = arith.constant 0 : i32
    %14 = arith.cmpi slt, %10, %c0_i32_6 : i32
    %15 = arith.xori %13, %14 : i1
    %16 = arith.andi %15, %12 : i1
    %17 = arith.addi %11, %10 : i32
    %18 = arith.select %16, %17, %11 : i32
    %19 = tpu.assume_multiple %18, 8 : i32
    %20 = arith.index_cast %19 : i32 to index
    %c0_7 = arith.constant 0 : index
    %21 = vector.load %arg1[%20, %c0_7] : memref<16x32xf32, #tpu.memory_space<vmem>>, vector<8x32xf32>
    %22 = arith.mulf %5, %21 : vector<8x32xf32>
    %cst_8 = arith.constant dense<0.000000e+00> : vector<8xf32>
    %23 = vector.multi_reduction <add>, %22, %cst_8 [1] : vector<8x32xf32> to vector<8xf32>
    %24 = vector.shape_cast %23 : vector<8xf32> to vector<8x1xf32>
    %cst_9 = arith.constant 2.000000e+00 : f32
    %25 = vector.broadcast %cst_9 : f32 to vector<8x16xf32>
    %26 = arith.subf %7, %25 : vector<8x16xf32>
    %27 = math.exp %26 : vector<8x16xf32>
    %cst_10 = arith.constant dense<0.000000e+00> : vector<8xf32>
    %28 = vector.multi_reduction <add>, %27, %cst_10 [1] : vector<8x16xf32> to vector<8xf32>
    %29 = vector.shape_cast %28 : vector<8xf32> to vector<8x1xf32>
    %cst_11 = arith.constant 1.000000e+00 : f32
    %30 = vector.broadcast %cst_11 : f32 to vector<8x1xf32>
    %31 = arith.subf %29, %30 : vector<8x1xf32>
    %cst_12 = arith.constant 1.000000e-30 : f32
    %32 = vector.broadcast %cst_12 : f32 to vector<8x1xf32>
    %33 = arith.maximumf %31, %32 : vector<8x1xf32>
    %34 = math.log %33 : vector<8x1xf32>
    %cst_13 = arith.constant 2.000000e+00 : f32
    %35 = vector.broadcast %cst_13 : f32 to vector<8x1xf32>
    %36 = arith.addf %35, %34 : vector<8x1xf32>
    %37 = tpu.iota {dimensions = array<i32: 0>} : vector<8x1xi32>
    %38 = vector.broadcast %1 : i32 to vector<8x1xi32>
    %39 = arith.addi %38, %37 : vector<8x1xi32>
    %c8_i32_14 = arith.constant 8 : i32
    %40 = vector.broadcast %c8_i32_14 : i32 to vector<8x1xi32>
    %41 = arith.cmpi slt, %39, %40 : vector<8x1xi32>
    %c8_i32_15 = arith.constant 8 : i32
    %42 = vector.broadcast %c8_i32_15 : i32 to vector<8x1xi32>
    %43 = arith.cmpi sge, %39, %42 : vector<8x1xi32>
    %c16_i32_16 = arith.constant 16 : i32
    %44 = vector.broadcast %c16_i32_16 : i32 to vector<8x1xi32>
    %45 = arith.cmpi slt, %39, %44 : vector<8x1xi32>
    %46 = arith.andi %43, %45 : vector<8x1xi1>
    %47 = arith.ori %41, %46 : vector<8x1xi1>
    %48 = arith.subf %36, %24 : vector<8x1xf32>
    %cst_17 = arith.constant 0.000000e+00 : f32
    %49 = vector.broadcast %cst_17 : f32 to vector<8x1xf32>
    %50 = arith.select %47, %48, %49 : vector<8x1xi1>, vector<8x1xf32>
    %c0_18 = arith.constant 0 : index
    %c0_19 = arith.constant 0 : index
    %51 = vector.load %arg3[%c0_18, %c0_19] : memref<8x1xf32, #tpu.memory_space<vmem>>, vector<8x1xf32>
    tpu.vector_store %arg3[%c0_18, %c0_19], %50 {strides = array<i32>} : memref<8x1xf32, #tpu.memory_space<vmem>>, vector<8x1xf32>,
    return
  }
  func.func @transform_0(%arg0: i32) -> (i32, i32) {
    %c0_i32 = arith.constant 0 : i32
    %c0_i32_0 = arith.constant 0 : i32
    %c0_i32_1 = arith.constant 0 : i32
    return %c0_i32, %c0_i32_0 : i32, i32
  }
  func.func @transform_1(%arg0: i32) -> (i32, i32) {
    %c0_i32 = arith.constant 0 : i32
    %c0_i32_0 = arith.constant 0 : i32
    %c0_i32_1 = arith.constant 0 : i32
    return %c0_i32, %c0_i32_0 : i32, i32
  }
  func.func @transform_2(%arg0: i32) -> (i32, i32) {
    %c0_i32 = arith.constant 0 : i32
    %c0_i32_0 = arith.constant 0 : i32
    return %arg0, %c0_i32 : i32, i32
  }
}

</mosaic_0001>

<bundles_post_ra>
// kernel: tpu_custom_call.1
= control target key start
LH: loop header
LB: loop body
LE: loop exit
PB: predicated region body
PF: predicated region fallthrough
CT: control target
= control target key end

     0   :  { %s361_s9 = smov 0   ;;  %s405_s0 = inlined_call_operand.vmem [shape: f32[16,32], index: 0, kind: input, shape index: {}]   ;;  %s406_s1 = inlined_call_operand.vmem [shape: f32[32,16], index: 1, kind: input, shape index: {}]   ;;  %s407_s2 = inlined_call_operand.vmem [shape: f32[16,1], index: 2, kind: output, shape index: {}]  }
   0x1 LB: > { %s367_s10 = sadd.s32 4294967295, %s342_s9   ;;  %p295_p0 = scmp.ge.s32.totalorder %s342_s9, 1  ;;  %s342_s9 = sphi %s361_s9, %s12_s9  }
   0x2   : > { %p102_p1 = scmp.lt.s32.totalorder %s342_s9, 3 }
   0x4   : > { %p103_p2 = pnand %p295_p0, %p102_p1 }
   0x5   : > { %s375_s13 = sshll.u32 (!%p103_p2), %s367_s10, 3  ;;  %p118_p5 = scmp.lt.s32.totalorder (!%p103_p2), %s367_s10, 1 }
   0x6   : > { %106 = sbr.rel (%p103_p2) target bundleno = 396 (0x18c), region = 28  ;;  %s123_s18 = scalar_lea.vmem (!%p103_p2), %s405_s0, %s375_s13 }
   0x7   : > { %s204_s23 = sadd.s32 (!%p103_p2), 8, %s375_s13 }
   0x8   : > { %s206_s24 = ssub.s32 (!%p103_p2), 0, %s204_s23  ;;  %p205_p3 = scmp.lt.s32.totalorder (!%p103_p2), %s204_s23, 0 }
   0x9   : > { %s299_s25 = smin.u32 (!%p103_p2), %s206_s24, %s204_s23 }
   0xa   : > { %s208_s26 = sand.u32 (!%p103_p2), 15, %s299_s25  }
   0xb   : > { %v129_v0 = vld [vmem:[%s406_s1 + $0x18] sm:$0xff]  ;;  %v344_v1 = vmov 0.0   ;;  %v128_v2 = vld [vmem:[%s406_s1 + $0x10] sm:$0xff]  ;;  %vm345_vm0 = vmmov 0   ;;  %v124_v3 = vld [vmem:[%s123_s18] sm:$0xff]  ;;  %vm130_vm1 = vcmask 261120   ;;  %v235_v19 = vlaneseq }
   0xc   : > { %311 = vmatprep.subr.mxu0 %v344_v1  ;;  %319 = vmatprep.mubr.msk.f32.mxu0 %vm345_vm0, %v344_v1  ;;  %v127_v4 = vld [vmem:[%s406_s1 + $0x8] sm:$0xff]  ;;  %v126_v5 = vld [vmem:[%s406_s1] sm:$0xff]  ;;  %v125_v6 = vmul.f32 2.0, %v124_v3  ;;  %s209_s27 = ssub.s32 0, %s208_s26  ;;  %vm226_vm2 = vcmask 130048   ;;  %v237_v21 = vstv %s375_s13  ;;  %s413_s10 = smov (!%p118_p5, %s367_s10), 1 }
   0xd   : > { %312 = vmatpush3.msra.mxu0 %v129_v0  ;;  %s409_s27 = smov (!%p205_p3, %s209_s27), %s208_s26  ;;  %v236_v20 = vshrl.u32 %v235_v19, 7  ;;  %s296_s4 = sshll.u32 %s413_s10, 3  ;;  %vm246_vm8 = vcmask 7168  }
   0xe   : > { %313 = vmatprep.subr.mxu0 %v344_v1  ;;  %p301_p4 = scmp.lt.s32.totalorder %s409_s27, 0  ;;  %s215_s28 = sadd.s32 16, %s409_s27 }
   0xf   : > { %314 = vmatpush3.msra.mxu0 %v128_v2  ;;  %v238_v22 = vadd.s32 %v237_v21, %v236_v20  ;;  %s121_s7 = scalar_lea.vmem %s407_s2, %s296_s4 }
  0x10   : > { %315 = vmatprep.subr.mxu0 %v344_v1  ;;  %s411_s28 = smov (!%p301_p4, %s215_s28), %s409_s27 }
  0x11   : > { %316 = vmatpush3.msra.mxu0 %v127_v4  ;;  %s217_s3 = scalar_lea.vmem %s405_s0, %s411_s28  ;;  %vm240_vm3 = vcmp.ge.s32.totalorder %v238_v22, 8  ;;  %vm241_vm4 = vcmp.lt.s32.totalorder %v238_v22, 16  ;;  %vm239_vm5 = vcmp.lt.s32.totalorder %v238_v22, 8 }
  0x12   : > { %317 = vmatprep.subr.mxu0 %v344_v1  ;;  %v218_v11 = vld [vmem:[%s217_s3] sm:$0xff]  ;;  %vm242_vm6 = vmand %vm240_vm3, %vm241_vm4 }
  0x13   : > { %318 = vmatpush3.msra.mxu0 %v126_v5  ;;  %v219_v12 = vmul.f32 %v218_v11, %v125_v6  ;;  %vm243_vm7 = vmor %vm239_vm5, %vm242_vm6 }
  0x14   : > { %320 = vmatmul.mubr.msk.f32.vlgmr.msra.gmra.mxu0 %vm130_vm1, %v125_v6 }
  0x15   : > { %v220_v15 = vsel %vm130_vm1, %v219_v12, 0.0 }
  0xd4   : > { %v200_v7 = vpop.f32.mrf.mxu0 }
  0xd5   : > { %v302_v8 = vadd.f32 -2.0, %v200_v7 }
  0xd6   : > { %v321_v9 = vpop.f32.mrf.mxu0 }
  0xd7   : > { %v224_v10 = vmul.f32 1.442695, %v302_v8 }
  0xd9   : > { %332 = vpow2.f32 %v224_v10 }
  0xe6   : > { %v333_v13 = vpop.eup %332 }
  0xe7   : > { %v227_v14 = vsel %vm226_vm2, %v333_v13, 0.0 }
  0xe8   : > { %228 = vadd.xlane.f32.xlu0 %v227_v14 }
  0xec   : > { %221 = vadd.xlane.f32.xlu0 %v220_v15 }
 0x171   : > { %v229_v16 = vpop.xlane.xlu0 %228 }
 0x172   : > { %v303_v17 = vadd.f32 -1.0, %v229_v16 }
 0x174   : > { %v231_v18 = vmax.f32 %v303_v17, 1e-30 }
 0x175   : > { %v222_v25 = vpop.xlane.xlu0 %221 }
 0x176   : > { %334 = vlog2.f32 %v231_v18 }
 0x183   : > { %v335_v23 = vpop.eup %334 }
 0x184   : > { %v233_v24 = vmul.f32 0.6931472, %v335_v23 }
 0x186   : > { %v234_v26 = vadd.f32 2.0, %v233_v24 }
 0x188   : > { %v244_v27 = vsub.f32 %v234_v26, %v222_v25 }
 0x18a   : > { %v245_v28 = vsel %vm243_vm7, %v244_v27, 0.0 }
 0x18b   : > { %247 = vst.msk [vmem:[%s121_s7] sm:$0xff] %vm246_vm8, %v245_v28 }
 0x18c PF: > { %s12_s9 = sadd.s32 1, %s342_s9  }
 0x18d   : > { %p9_p6 = scmp.ge.s32.totalorder %s12_s9, 4  }
 0x18f   :  { %11 = sbr.rel (!%p9_p6) target bundleno = 1 (0x1), region = 57 }

</bundles_post_ra>
